<compile_context>
chip_gen: v6e
topology: v6e:2x2x1
jax: 0.10.0
libtpu: 0.0.40
codegen_flags: <defaults>
</compile_context>

<pallas_src>
import jax
import jax.numpy as jnp
from jax.experimental import pallas as pl
from jax.experimental.pallas import tpu as pltpu


_LANE = 1024     # lane-dense last dim (multiple of 128)
_MAX_TM = 512    # rows per tile -> 2 MiB per f32 buffer


def _swish_kernel(x_ref, o_ref):
    xf = x_ref[...].astype(jnp.float32)
    o_ref[...] = (xf * jax.nn.sigmoid(xf)).astype(o_ref.dtype)


def _round_up(n: int, m: int) -> int:
    return ((n + m - 1) // m) * m


def swish(x: jax.Array) -> jax.Array:
    """Elementwise x * sigmoid(x), any shape/dtype (matches PyTorch Swish)."""
    orig_shape = x.shape
    orig_dtype = x.dtype
    total = x.size
    if total == 0:
        return x

    flat = x.reshape(-1)

    # Lane-dense 2-D view: (rows, _LANE), rows a multiple of the tile height.
    rows = _round_up(pl.cdiv(total, _LANE), 8)     # sublane alignment
    tm = min(_MAX_TM, rows)
    rows = _round_up(rows, tm)
    padded_total = rows * _LANE
    if padded_total != total:
        flat = jnp.pad(flat, (0, padded_total - total))
    x2d = flat.reshape(rows, _LANE)

    out = pl.pallas_call(
        _swish_kernel,
        out_shape=jax.ShapeDtypeStruct((rows, _LANE), orig_dtype),
        grid_spec=pltpu.PrefetchScalarGridSpec(
            num_scalar_prefetch=0,
            grid=(rows // tm,),
            in_specs=[pl.BlockSpec((tm, _LANE), lambda i: (i, 0))],
            out_specs=pl.BlockSpec((tm, _LANE), lambda i: (i, 0)),
        ),
        compiler_params=pltpu.CompilerParams(
            dimension_semantics=("parallel",),
            vmem_limit_bytes=32 * 1024 * 1024,
        ),
    )(x2d)

    return out.reshape(-1)[:total].reshape(orig_shape)


if __name__ == "__main__":
    key = jax.random.PRNGKey(0)
    # NCHW input, small shapes: batch=2, channels=4, spatial=16x16
    x = jax.random.normal(key, (2, 4, 16, 16), dtype=jnp.float32)

    y = jax.block_until_ready(swish(x))

    # Reference check against plain JAX
    y_ref = x * jax.nn.sigmoid(x)
    assert y.shape == x.shape and y.dtype == x.dtype
    assert jnp.allclose(y, y_ref, atol=1e-6, rtol=1e-6)

    print("KERNEL_OK")
</pallas_src>

<mosaic_0001>
module attributes {stable_mosaic.version = 11 : i64} {
  func.func @_swish_kernel(%arg0: i32, %arg1: memref<8x1024xf32, #tpu.memory_space<vmem>>, %arg2: memref<8x1024xf32, #tpu.memory_space<vmem>>) attributes {dimension_semantics = [#tpu.dimension_semantics<parallel>], iteration_bounds = array<i64: 1>, scalar_prefetch = 0 : i64, scratch_operands = 0 : i64, tpu.core_type = #tpu.core_type<tc>, window_params = [{transform_indices = @transform_0, window_bounds = array<i64: 8, 1024>}, {transform_indices = @transform_1, window_bounds = array<i64: 8, 1024>}]} {
    %c0 = arith.constant 0 : index
    %c0_0 = arith.constant 0 : index
    %0 = vector.load %arg1[%c0, %c0_0] : memref<8x1024xf32, #tpu.memory_space<vmem>>, vector<8x1024xf32>
    %1 = arith.negf %0 : vector<8x1024xf32>
    %2 = math.exp %1 : vector<8x1024xf32>
    %cst = arith.constant 1.000000e+00 : f32
    %3 = vector.broadcast %cst : f32 to vector<8x1024xf32>
    %4 = arith.addf %3, %2 : vector<8x1024xf32>
    %5 = arith.divf %3, %4 : vector<8x1024xf32>
    %6 = arith.mulf %0, %5 : vector<8x1024xf32>
    %c0_1 = arith.constant 0 : index
    %c0_2 = arith.constant 0 : index
    %7 = vector.load %arg2[%c0_1, %c0_2] : memref<8x1024xf32, #tpu.memory_space<vmem>>, vector<8x1024xf32>
    tpu.vector_store %arg2[%c0_1, %c0_2], %6 {strides = array<i32>} : memref<8x1024xf32, #tpu.memory_space<vmem>>, vector<8x1024xf32>,
    return
  }
  func.func @transform_0(%arg0: i32) -> (i32, i32) {
    %c0_i32 = arith.constant 0 : i32
    %c0_i32_0 = arith.constant 0 : i32
    return %arg0, %c0_i32 : i32, i32
  }
  func.func @transform_1(%arg0: i32) -> (i32, i32) {
    %c0_i32 = arith.constant 0 : i32
    %c0_i32_0 = arith.constant 0 : i32
    return %arg0, %c0_i32 : i32, i32
  }
}

</mosaic_0001>

<bundles_post_ra>
// kernel: tpu_custom_call.1
= control target key start
LH: loop header
LB: loop body
LE: loop exit
PB: predicated region body
PF: predicated region fallthrough
CT: control target
= control target key end

     0   :  { %6 = vsyncpa [#allocation3], 0  ;;  %s212_s0 = inlined_call_operand.hbm [shape: f32[8,1024], index: 0, kind: input, shape index: {}]   ;;  %s213_s1 = inlined_call_operand.hbm [shape: f32[8,1024], index: 1, kind: output, shape index: {}]  }
   0x1   :  { %7 = vsyncpa [#allocation4], 0  ;;  %s194_s6 = smov [#allocation2]  }
   0x2   :  { %s14_s7 = sshll.u32 %s194_s6, 4  ;;  %s15_s7 = int_to_ptr.vmem [resolvable:$true] %s14_s7 }
   0x3   :  { %s158_s8 = scalar_lea.vmem %s15_s7, 1024  ;;  %p163_p1 = scmp.lt.s32.totalorder %s15_s7, %s15_s7 }
   0x4   :  { %p159_p0 = scmp.ne.s32.totalorder %s15_s7, %s158_s8  ;;  %p164_p2 = scmp.lt.s32.totalorder %s158_s8, %s158_s8 }
   0x6   :  { %p165_p3 = por %p164_p2, %p163_p1 }
   0x8   :  { %p166_p4 = pnand %p165_p3, %p159_p0 }
   0xa   :  { %169 = shalt.err (!%p166_p4)
}
   0xb   :  { %17 = dma.hbm_to_vmem [thread:$0]  %s212_s0, 1024, %s15_s7, [#allocation3]  }
   0xc   :  { %190 = dma.done.wait [#allocation3], 1024  }
   0xd   :  { %191 = vsyncadd [#allocation3], 4294966272  ;;  %v21_v0 = vld [vmem:[#allocation2] sm:$0xff]  ;;  %v22_v1 = vld [vmem:[#allocation2 + $0x8] sm:$0xff]  ;;  %s195_s0 = smov [#allocation5]  }
   0xe   :  { %v23_v2 = vld [vmem:[#allocation2 + $0x10] sm:$0xff]  ;;  %v108_v3 = vmul.f32 -1.442695, %v21_v0  ;;  %v109_v4 = vmul.f32 -1.442695, %v22_v1  ;;  %v24_v6 = vld [vmem:[#allocation2 + $0x18] sm:$0xff] }
   0xf   :  { %v110_v5 = vmul.f32 -1.442695, %v23_v2  ;;  %v25_v7 = vld [vmem:[#allocation2 + $0x20] sm:$0xff]  ;;  %v26_v8 = vld [vmem:[#allocation2 + $0x28] sm:$0xff]  ;;  %v111_v9 = vmul.f32 -1.442695, %v24_v6 }
  0x10   :  { %118 = vpow2.f32 %v108_v3  ;;  %v112_v10 = vmul.f32 -1.442695, %v25_v7  ;;  %v113_v11 = vmul.f32 -1.442695, %v26_v8  ;;  %v27_v12 = vld [vmem:[#allocation2 + $0x30] sm:$0xff]  ;;  %v28_v13 = vld [vmem:[#allocation2 + $0x38] sm:$0xff] }
  0x11   :  { %120 = vpow2.f32 %v109_v4  ;;  %v114_v14 = vmul.f32 -1.442695, %v27_v12  ;;  %v115_v15 = vmul.f32 -1.442695, %v28_v13  ;;  %s99_s11 = sshll.u32 %s195_s0, 4  ;;  %s100_s11 = int_to_ptr.vmem [resolvable:$true] %s99_s11 }
  0x12   :  { %122 = vpow2.f32 %v110_v5  ;;  %s170_s12 = scalar_lea.vmem %s100_s11, 1024  ;;  %p175_p6 = scmp.lt.s32.totalorder %s100_s11, %s100_s11 }
  0x13   :  { %124 = vpow2.f32 %v111_v9  ;;  %p171_p5 = scmp.ne.s32.totalorder %s100_s11, %s170_s12  ;;  %p176_p7 = scmp.lt.s32.totalorder %s170_s12, %s170_s12 }
  0x14   :  { %126 = vpow2.f32 %v112_v10 }
  0x15   :  { %128 = vpow2.f32 %v113_v11  ;;  %p177_p8 = por %p176_p7, %p175_p6 }
  0x16   :  { %130 = vpow2.f32 %v114_v14 }
  0x17   :  { %132 = vpow2.f32 %v115_v15  ;;  %p178_p9 = pnand %p177_p8, %p171_p5 }
  0x1d   :  { %v119_v16 = vpop.eup %118 }
  0x1e   :  { %v121_v17 = vpop.eup %120  ;;  %v53_v18 = vadd.f32 1.0, %v119_v16 }
  0x1f   :  { %v123_v19 = vpop.eup %122  ;;  %v54_v20 = vadd.f32 1.0, %v121_v17 }
  0x20   :  { %v125_v21 = vpop.eup %124  ;;  %134 = vrcp.f32 %v53_v18  ;;  %v55_v22 = vadd.f32 1.0, %v123_v19 }
  0x21   :  { %v127_v23 = vpop.eup %126  ;;  %136 = vrcp.f32 %v54_v20  ;;  %v56_v24 = vadd.f32 1.0, %v125_v21 }
  0x22   :  { %v129_v25 = vpop.eup %128  ;;  %138 = vrcp.f32 %v55_v22  ;;  %v57_v26 = vadd.f32 1.0, %v127_v23 }
  0x23   :  { %v131_v27 = vpop.eup %130  ;;  %140 = vrcp.f32 %v56_v24  ;;  %v58_v28 = vadd.f32 1.0, %v129_v25 }
  0x24   :  { %v133_v29 = vpop.eup %132  ;;  %142 = vrcp.f32 %v57_v26  ;;  %v59_v30 = vadd.f32 1.0, %v131_v27 }
  0x25   :  { %144 = vrcp.f32 %v58_v28  ;;  %v60_v31 = vadd.f32 1.0, %v133_v29 }
  0x26   :  { %146 = vrcp.f32 %v59_v30 }
  0x27   :  { %148 = vrcp.f32 %v60_v31 }
  0x2d   :  { %v135_v32 = vpop.eup %134 }
  0x2e   :  { %v137_v33 = vpop.eup %136  ;;  %v77_v34 = vmul.f32 %v135_v32, %v21_v0 }
  0x2f   :  { %v139_v35 = vpop.eup %138  ;;  %v78_v36 = vmul.f32 %v137_v33, %v22_v1 }
  0x30   :  { %v141_v37 = vpop.eup %140  ;;  %85 = vst [vmem:[#allocation5] sm:$0xff] %v77_v34  ;;  %v79_v38 = vmul.f32 %v139_v35, %v23_v2 }
  0x31   :  { %v143_v39 = vpop.eup %142  ;;  %86 = vst [vmem:[#allocation5 + $0x8] sm:$0xff] %v78_v36  ;;  %v80_v40 = vmul.f32 %v141_v37, %v24_v6 }
  0x32   :  { %v145_v41 = vpop.eup %144  ;;  %87 = vst [vmem:[#allocation5 + $0x10] sm:$0xff] %v79_v38  ;;  %v81_v42 = vmul.f32 %v143_v39, %v25_v7 }
  0x33   :  { %v147_v43 = vpop.eup %146  ;;  %88 = vst [vmem:[#allocation5 + $0x18] sm:$0xff] %v80_v40  ;;  %v82_v44 = vmul.f32 %v145_v41, %v26_v8 }
  0x34   :  { %v149_v45 = vpop.eup %148  ;;  %89 = vst [vmem:[#allocation5 + $0x20] sm:$0xff] %v81_v42  ;;  %v83_v46 = vmul.f32 %v147_v43, %v27_v12 }
  0x35   :  { %90 = vst [vmem:[#allocation5 + $0x28] sm:$0xff] %v82_v44  ;;  %v84_v47 = vmul.f32 %v149_v45, %v28_v13 }
  0x36   :  { %91 = vst [vmem:[#allocation5 + $0x30] sm:$0xff] %v83_v46 }
  0x37   :  { %92 = vst [vmem:[#allocation5 + $0x38] sm:$0xff] %v84_v47 }
  0x38   :  { %181 = shalt.err (!%p178_p9)
}
  0x39   :  { %102 = dma.vmem_to_hbm [thread:$0]  %s100_s11, 1024, %s213_s1, [#allocation4]  }
  0x3a   :  { %192 = dma.done.wait [#allocation4], 1024  }
  0x3b   :  { %193 = vsyncadd [#allocation4], 4294966272 }
  0x3c   :  { %106 = vsyncpa [#allocation3], 1 }
  0x3d   :  { %107 = vsyncpa [#allocation4], 1 }

</bundles_post_ra>
